<compile_context>
chip_gen: v7x
topology: tpu7x:2x2x1
jax: 0.10.0
libtpu: 0.0.40
codegen_flags: <defaults>
</compile_context>

<pallas_src>
import functools

import jax
import jax.numpy as jnp
from jax.experimental import pallas as pl
from jax.experimental.pallas import tpu as pltpu


def _round_up(n, m):
    return ((n + m - 1) // m) * m


def _pad_to(a, shape):
    return jnp.pad(a, [(0, t - s) for s, t in zip(a.shape, shape)])


def mlp_kernel(x_ref, w1_ref, b1_ref, w2_ref, b2_ref, w3_ref, b3_ref, o_ref):
    # Three MXU matmuls (bf16 operands, f32 accumulation) + VPU bias/relu, all VMEM-resident.
    h1 = jnp.dot(x_ref[...], w1_ref[...], preferred_element_type=jnp.float32) + b1_ref[...]
    h1 = jnp.maximum(h1, 0.0).astype(jnp.bfloat16)
    h2 = jnp.dot(h1, w2_ref[...], preferred_element_type=jnp.float32) + b2_ref[...]
    h2 = jnp.maximum(h2, 0.0).astype(jnp.bfloat16)
    y = jnp.dot(h2, w3_ref[...], preferred_element_type=jnp.float32) + b3_ref[...]
    o_ref[...] = y.astype(o_ref.dtype)


@functools.partial(jax.jit, static_argnames=("tile_b",))
def mnist_dnn_forward(x, w1, b1, w2, b2, w3, b3, *, tile_b=128):
    """x: [B, in_dim] f32. w*: [in, out] f32, b*: [1, out] f32. Returns [B, out_dim] f32."""
    B, in_dim = x.shape
    h1_dim = w1.shape[1]
    h2_dim = w2.shape[1]
    out_dim = w3.shape[1]

    # Lane-dense / MXU-friendly padded dims (multiples of 128).
    K = _round_up(in_dim, 128)        # 784 -> 896
    H1 = _round_up(h1_dim, 128)       # 128 -> 128
    H2 = _round_up(h2_dim, 128)       # 64  -> 128
    OUT = _round_up(out_dim, 128)     # 10  -> 128
    Bp = _round_up(B, tile_b)

    # Zero-pad + cast operands to bf16 (biases stay f32: added to f32 accumulators).
    x_p = _pad_to(x, (Bp, K)).astype(jnp.bfloat16)
    w1_p = _pad_to(w1, (K, H1)).astype(jnp.bfloat16)
    w2_p = _pad_to(w2, (H1, H2)).astype(jnp.bfloat16)
    w3_p = _pad_to(w3, (H2, OUT)).astype(jnp.bfloat16)
    b1_p = _pad_to(b1, (1, H1)).astype(jnp.float32)
    b2_p = _pad_to(b2, (1, H2)).astype(jnp.float32)
    b3_p = _pad_to(b3, (1, OUT)).astype(jnp.float32)

    grid = (Bp // tile_b,)
    flops = 2 * Bp * (K * H1 + H1 * H2 + H2 * OUT)
    bytes_accessed = (
        x_p.size * 2 + w1_p.size * 2 + w2_p.size * 2 + w3_p.size * 2
        + (b1_p.size + b2_p.size + b3_p.size) * 4 + Bp * OUT * 4
    )

    # Weights/biases use a constant index_map -> DMA'd once, VMEM-resident across grid steps.
    const = lambda shape: pl.BlockSpec(shape, lambda i: (0, 0))

    out_p = pl.pallas_call(
        mlp_kernel,
        out_shape=jax.ShapeDtypeStruct((Bp, OUT), jnp.float32),
        grid=grid,
        in_specs=[
            pl.BlockSpec((tile_b, K), lambda i: (i, 0)),   # x: batch-tiled
            const((K, H1)), const((1, H1)),
            const((H1, H2)), const((1, H2)),
            const((H2, OUT)), const((1, OUT)),
        ],
        out_specs=pl.BlockSpec((tile_b, OUT), lambda i: (i, 0)),
        compiler_params=pltpu.CompilerParams(
            dimension_semantics=("parallel",),             # batch axis -> both TCs on v7x
        ),
        cost_estimate=pl.CostEstimate(
            flops=flops, transcendentals=0, bytes_accessed=bytes_accessed
        ),
    )(x_p, w1_p, b1_p, w2_p, b2_p, w3_p, b3_p)

    # Strip the batch / output-column padding.
    return out_p[:B, :out_dim]


def init_linear(key, fan_in, fan_out):
    # Deterministic init mimicking nn.Linear default: U(-1/sqrt(fan_in), 1/sqrt(fan_in)).
    kw, kb = jax.random.split(key)
    bound = 1.0 / jnp.sqrt(jnp.float32(fan_in))
    w = jax.random.uniform(kw, (fan_in, fan_out), jnp.float32, -bound, bound)
    b = jax.random.uniform(kb, (1, fan_out), jnp.float32, -bound, bound)
    return w, b


if __name__ == "__main__":
    # Shapes from the module: flattened 28x28 MNIST image -> 3 Linear layers.
    batch = 256            # multiple of TILE_B=128; exercises the batch grid (grid=(2,))
    input_dim = 784
    hidden_1 = 128
    hidden_2 = 64
    output_dim = 10

    key = jax.random.PRNGKey(0)
    kx, k1, k2, k3 = jax.random.split(key, 4)

    x = jax.random.normal(kx, (batch, input_dim), jnp.float32)
    w1, b1 = init_linear(k1, input_dim, hidden_1)
    w2, b2 = init_linear(k2, hidden_1, hidden_2)
    w3, b3 = init_linear(k3, hidden_2, output_dim)

    y = mnist_dnn_forward(x, w1, b1, w2, b2, w3, b3, tile_b=128)
    y = jax.block_until_ready(y)

    # Pure-JAX f32 reference (same semantics as the PyTorch forward).
    h1 = jnp.maximum(x @ w1 + b1, 0.0)
    h2 = jnp.maximum(h1 @ w2 + b2, 0.0)
    y_ref = h2 @ w3 + b3

    assert y.shape == (batch, output_dim)
    # bf16 operands -> loosened tolerance vs the f32 reference.
    assert jnp.allclose(y, y_ref, atol=5e-2, rtol=5e-2), float(jnp.max(jnp.abs(y - y_ref)))

    print("KERNEL_OK")
</pallas_src>

<mosaic_0001>
module attributes {stable_mosaic.version = 11 : i64} {
  func.func @mlp_kernel(%arg0: i32, %arg1: memref<128x896xbf16, #tpu.memory_space<vmem>>, %arg2: memref<896x128xbf16, #tpu.memory_space<vmem>>, %arg3: memref<1x128xf32, #tpu.memory_space<vmem>>, %arg4: memref<128x128xbf16, #tpu.memory_space<vmem>>, %arg5: memref<1x128xf32, #tpu.memory_space<vmem>>, %arg6: memref<128x128xbf16, #tpu.memory_space<vmem>>, %arg7: memref<1x128xf32, #tpu.memory_space<vmem>>, %arg8: memref<128x128xf32, #tpu.memory_space<vmem>>) attributes {dimension_semantics = [#tpu.dimension_semantics<parallel>], iteration_bounds = array<i64: 2>, scalar_prefetch = 0 : i64, scratch_operands = 0 : i64, tpu.core_type = #tpu.core_type<tc>, window_params = [{transform_indices = @transform_0, window_bounds = array<i64: 128, 896>}, {pipeline_mode = #tpu.pipeline_mode<synchronous>, transform_indices = @transform_1, window_bounds = array<i64: 896, 128>}, {pipeline_mode = #tpu.pipeline_mode<synchronous>, transform_indices = @transform_2, window_bounds = array<i64: 1, 128>}, {pipeline_mode = #tpu.pipeline_mode<synchronous>, transform_indices = @transform_3, window_bounds = array<i64: 128, 128>}, {pipeline_mode = #tpu.pipeline_mode<synchronous>, transform_indices = @transform_4, window_bounds = array<i64: 1, 128>}, {pipeline_mode = #tpu.pipeline_mode<synchronous>, transform_indices = @transform_5, window_bounds = array<i64: 128, 128>}, {pipeline_mode = #tpu.pipeline_mode<synchronous>, transform_indices = @transform_6, window_bounds = array<i64: 1, 128>}, {transform_indices = @transform_7, window_bounds = array<i64: 128, 128>}]} {
    %c0 = arith.constant 0 : index
    %c0_0 = arith.constant 0 : index
    %0 = vector.load %arg1[%c0, %c0_0] : memref<128x896xbf16, #tpu.memory_space<vmem>>, vector<128x896xbf16>
    %c0_1 = arith.constant 0 : index
    %c0_2 = arith.constant 0 : index
    %1 = vector.load %arg2[%c0_1, %c0_2] : memref<896x128xbf16, #tpu.memory_space<vmem>>, vector<896x128xbf16>
    %cst = arith.constant dense<0.000000e+00> : vector<128x128xf32>
    %2 = tpu.matmul %0, %1, %cst {dimension_numbers = #tpu.dot_dimension_numbers<[1], [0], [0], [1], [0, 0, 1, 1], [], []>} : vector<128x896xbf16>, vector<896x128xbf16>, vector<128x128xf32> -> vector<128x128xf32>
    %c0_3 = arith.constant 0 : index
    %c0_4 = arith.constant 0 : index
    %3 = vector.load %arg3[%c0_3, %c0_4] : memref<1x128xf32, #tpu.memory_space<vmem>>, vector<1x128xf32>
    %4 = vector.broadcast %3 : vector<1x128xf32> to vector<128x128xf32>
    %5 = arith.addf %2, %4 : vector<128x128xf32>
    %cst_5 = arith.constant 0.000000e+00 : f32
    %6 = vector.broadcast %cst_5 : f32 to vector<128x128xf32>
    %7 = arith.maximumf %5, %6 : vector<128x128xf32>
    %8 = arith.truncf %7 : vector<128x128xf32> to vector<128x128xbf16>
    %c0_6 = arith.constant 0 : index
    %c0_7 = arith.constant 0 : index
    %9 = vector.load %arg4[%c0_6, %c0_7] : memref<128x128xbf16, #tpu.memory_space<vmem>>, vector<128x128xbf16>
    %cst_8 = arith.constant dense<0.000000e+00> : vector<128x128xf32>
    %10 = tpu.matmul %8, %9, %cst_8 {dimension_numbers = #tpu.dot_dimension_numbers<[1], [0], [0], [1], [0, 0, 1, 1], [], []>} : vector<128x128xbf16>, vector<128x128xbf16>, vector<128x128xf32> -> vector<128x128xf32>
    %c0_9 = arith.constant 0 : index
    %c0_10 = arith.constant 0 : index
    %11 = vector.load %arg5[%c0_9, %c0_10] : memref<1x128xf32, #tpu.memory_space<vmem>>, vector<1x128xf32>
    %12 = vector.broadcast %11 : vector<1x128xf32> to vector<128x128xf32>
    %13 = arith.addf %10, %12 : vector<128x128xf32>
    %cst_11 = arith.constant 0.000000e+00 : f32
    %14 = vector.broadcast %cst_11 : f32 to vector<128x128xf32>
    %15 = arith.maximumf %13, %14 : vector<128x128xf32>
    %16 = arith.truncf %15 : vector<128x128xf32> to vector<128x128xbf16>
    %c0_12 = arith.constant 0 : index
    %c0_13 = arith.constant 0 : index
    %17 = vector.load %arg6[%c0_12, %c0_13] : memref<128x128xbf16, #tpu.memory_space<vmem>>, vector<128x128xbf16>
    %cst_14 = arith.constant dense<0.000000e+00> : vector<128x128xf32>
    %18 = tpu.matmul %16, %17, %cst_14 {dimension_numbers = #tpu.dot_dimension_numbers<[1], [0], [0], [1], [0, 0, 1, 1], [], []>} : vector<128x128xbf16>, vector<128x128xbf16>, vector<128x128xf32> -> vector<128x128xf32>
    %c0_15 = arith.constant 0 : index
    %c0_16 = arith.constant 0 : index
    %19 = vector.load %arg7[%c0_15, %c0_16] : memref<1x128xf32, #tpu.memory_space<vmem>>, vector<1x128xf32>
    %20 = vector.broadcast %19 : vector<1x128xf32> to vector<128x128xf32>
    %21 = arith.addf %18, %20 : vector<128x128xf32>
    %c0_17 = arith.constant 0 : index
    %c0_18 = arith.constant 0 : index
    %22 = vector.load %arg8[%c0_17, %c0_18] : memref<128x128xf32, #tpu.memory_space<vmem>>, vector<128x128xf32>
    tpu.vector_store %arg8[%c0_17, %c0_18], %21 {strides = array<i32>} : memref<128x128xf32, #tpu.memory_space<vmem>>, vector<128x128xf32>,
    return
  }
  func.func @transform_0(%arg0: i32) -> (i32, i32) {
    %c0_i32 = arith.constant 0 : i32
    %c0_i32_0 = arith.constant 0 : i32
    return %arg0, %c0_i32 : i32, i32
  }
  func.func @transform_1(%arg0: i32) -> (i32, i32) {
    %c0_i32 = arith.constant 0 : i32
    %c0_i32_0 = arith.constant 0 : i32
    %c0_i32_1 = arith.constant 0 : i32
    return %c0_i32, %c0_i32_0 : i32, i32
  }
  func.func @transform_2(%arg0: i32) -> (i32, i32) {
    %c0_i32 = arith.constant 0 : i32
    %c0_i32_0 = arith.constant 0 : i32
    %c0_i32_1 = arith.constant 0 : i32
    return %c0_i32, %c0_i32_0 : i32, i32
  }
  func.func @transform_3(%arg0: i32) -> (i32, i32) {
    %c0_i32 = arith.constant 0 : i32
    %c0_i32_0 = arith.constant 0 : i32
    %c0_i32_1 = arith.constant 0 : i32
    return %c0_i32, %c0_i32_0 : i32, i32
  }
  func.func @transform_4(%arg0: i32) -> (i32, i32) {
    %c0_i32 = arith.constant 0 : i32
    %c0_i32_0 = arith.constant 0 : i32
    %c0_i32_1 = arith.constant 0 : i32
    return %c0_i32, %c0_i32_0 : i32, i32
  }
  func.func @transform_5(%arg0: i32) -> (i32, i32) {
    %c0_i32 = arith.constant 0 : i32
    %c0_i32_0 = arith.constant 0 : i32
    %c0_i32_1 = arith.constant 0 : i32
    return %c0_i32, %c0_i32_0 : i32, i32
  }
  func.func @transform_6(%arg0: i32) -> (i32, i32) {
    %c0_i32 = arith.constant 0 : i32
    %c0_i32_0 = arith.constant 0 : i32
    %c0_i32_1 = arith.constant 0 : i32
    return %c0_i32, %c0_i32_0 : i32, i32
  }
  func.func @transform_7(%arg0: i32) -> (i32, i32) {
    %c0_i32 = arith.constant 0 : i32
    %c0_i32_0 = arith.constant 0 : i32
    return %arg0, %c0_i32 : i32, i32
  }
}

</mosaic_0001>

<bundles_post_ra>
// kernel: mnist_dnn_forward.1
= control target key start
LH: loop header
LB: loop body
LE: loop exit
PB: predicated region body
PF: predicated region fallthrough
CT: control target
= control target key end

     0   :  { %s2640_s24 = smov 0   ;;  %s3075_s0 = inlined_call_operand.vmem [shape: bf16[256,896], index: 0, kind: input, shape index: {}]   ;;  %s3076_s1 = inlined_call_operand.vmem [shape: bf16[896,128], index: 1, kind: input, shape index: {}]   ;;  %s3077_s2 = inlined_call_operand.vmem [shape: f32[1,128], index: 2, kind: input, shape index: {}]   ;;  %s3078_s3 = inlined_call_operand.vmem [shape: bf16[128,128], index: 3, kind: input, shape index: {}]   ;;  %s3079_s4 = inlined_call_operand.vmem [shape: f32[1,128], index: 4, kind: input, shape index: {}]   ;;  %s3080_s5 = inlined_call_operand.vmem [shape: bf16[128,128], index: 5, kind: input, shape index: {}]   ;;  %s3081_s6 = inlined_call_operand.vmem [shape: f32[1,128], index: 6, kind: input, shape index: {}]   ;;  %s3082_s7 = inlined_call_operand.vmem [shape: f32[256,128], index: 7, kind: output, shape index: {}]  }
   0x1 LB: > { %s1937_s25 = sadd.s32 4294967295, %s2598_s24   ;;  %p1941_p0 = scmp.ge.s32.totalorder %s2598_s24, 1  ;;  %s2598_s24 = sphi %s2640_s24, %s17_s24  }
   0x2   : > { %p239_p1 = scmp.lt.s32.totalorder %s2598_s24, 3 }
   0x4   : > { %p240_p2 = pnand %p1941_p0, %p239_p1 }
   0x5   : > { %v2440_v0 = vld [vmem:[%s3076_s1 + $0x40] sm:$0xff] (!%p240_p2)   ;;  %v2444_v4 = vld [vmem:[%s3076_s1 + $0x48] sm:$0xff] (!%p240_p2)   ;;  %v2448_v8 = vld [vmem:[%s3076_s1 + $0x50] sm:$0xff] (!%p240_p2)   ;;  %s1942_s10 = sshll.u32 (!%p240_p2), %s1937_s25, 4 }
   0x6   : > { %243 = sbr.rel (%p240_p2) target bundleno = 823 (0x337), region = 48  ;;  %v2441_v1 = vld [vmem:[%s3076_s1] sm:$0xff] (!%p240_p2)   ;;  %2079 = vmatprep.subr.bf16.mxu0 (!%p240_p2), %v2440_v0  ;;  %v2445_v5 = vld [vmem:[%s3076_s1 + $0x8] sm:$0xff] (!%p240_p2)   ;;  %v2449_v9 = vld [vmem:[%s3076_s1 + $0x10] sm:$0xff] (!%p240_p2)   ;;  %p273_p3 = scmp.lt.s32.totalorder (!%p240_p2), %s1942_s10, 31 }
   0x7   : > { %v2442_v2 = vld [vmem:[%s3076_s1 + $0xc0] sm:$0xff] (!%p240_p2)   ;;  %2080 = vmatpush3.bf16.msra.mxu0 (!%p240_p2), %v2441_v1  ;;  %v2446_v6 = vld [vmem:[%s3076_s1 + $0xc8] sm:$0xff] (!%p240_p2)   ;;  %v2450_v10 = vld [vmem:[%s3076_s1 + $0xd0] sm:$0xff] (!%p240_p2)  }
   0x8   : > { %v2443_v3 = vld [vmem:[%s3076_s1 + $0x80] sm:$0xff] (!%p240_p2)   ;;  %2143 = vmatprep.subr.bf16.mxu1 (!%p240_p2), %v2442_v2  ;;  %2081 = vmatprep.subr.bf16.mxu0 (!%p240_p2), %v2444_v4  ;;  %v2447_v7 = vld [vmem:[%s3076_s1 + $0x88] sm:$0xff] (!%p240_p2)   ;;  %v2451_v11 = vld [vmem:[%s3076_s1 + $0x90] sm:$0xff] (!%p240_p2)  }
   0x9   : > { %2144 = vmatpush3.bf16.msra.mxu1 (!%p240_p2), %v2443_v3  ;;  %v2452_v12 = vld [vmem:[%s3076_s1 + $0x58] sm:$0xff] (!%p240_p2)   ;;  %v2456_v16 = vld [vmem:[%s3076_s1 + $0x60] sm:$0xff] (!%p240_p2)   ;;  %v2460_v20 = vld [vmem:[%s3076_s1 + $0x68] sm:$0xff] (!%p240_p2)  }
   0xa   : > { %2145 = vmatprep.subr.bf16.mxu1 (!%p240_p2), %v2446_v6  ;;  %v2453_v13 = vld [vmem:[%s3076_s1 + $0x18] sm:$0xff] (!%p240_p2)   ;;  %v2457_v17 = vld [vmem:[%s3076_s1 + $0x20] sm:$0xff] (!%p240_p2)   ;;  %v2461_v21 = vld [vmem:[%s3076_s1 + $0x28] sm:$0xff] (!%p240_p2)  }
   0xb   : > { %2082 = vmatpush3.bf16.msra.mxu0 (!%p240_p2), %v2445_v5  ;;  %v2454_v14 = vld [vmem:[%s3076_s1 + $0xd8] sm:$0xff] (!%p240_p2)   ;;  %v2458_v18 = vld [vmem:[%s3076_s1 + $0xe0] sm:$0xff] (!%p240_p2)   ;;  %v2462_v22 = vld [vmem:[%s3076_s1 + $0xe8] sm:$0xff] (!%p240_p2)  }
   0xc   : > { %2083 = vmatprep.subr.bf16.mxu0 (!%p240_p2), %v2448_v8  ;;  %v2455_v15 = vld [vmem:[%s3076_s1 + $0x98] sm:$0xff] (!%p240_p2)   ;;  %v2459_v19 = vld [vmem:[%s3076_s1 + $0xa0] sm:$0xff] (!%p240_p2)   ;;  %v2463_v23 = vld [vmem:[%s3076_s1 + $0xa8] sm:$0xff] (!%p240_p2)  }
   0xd   : > { %2146 = vmatpush3.bf16.msra.mxu1 %v2447_v7  ;;  %s3084_s10 = smov (!%p273_p3, %s1942_s10), 31  ;;  %v2464_v24 = vld [vmem:[%s3076_s1 + $0x70] sm:$0xff]   ;;  %v2468_v28 = vld [vmem:[%s3076_s1 + $0x78] sm:$0xff]   ;;  %v2475_v34 = vld [vmem:[%s3076_s1 + $0x140] sm:$0xff]  }
   0xe   : > { %2147 = vmatprep.subr.bf16.mxu1 %v2450_v10  ;;  %s2431_s12 = smul.u32 28, %s3084_s10  ;;  %v2465_v25 = vld [vmem:[%s3076_s1 + $0x30] sm:$0xff]   ;;  %v2469_v29 = vld [vmem:[%s3076_s1 + $0x38] sm:$0xff]   ;;  %v2479_v37 = vld [vmem:[%s3076_s1 + $0x100] sm:$0xff]   ;;  %s1945_s11 = sshll.u32 %s3084_s10, 3 }
   0xf   : > { %2084 = vmatpush3.bf16.msra.mxu0 %v2449_v9  ;;  %v2466_v26 = vld [vmem:[%s3076_s1 + $0xf0] sm:$0xff]   ;;  %v2470_v30 = vld [vmem:[%s3076_s1 + $0xf8] sm:$0xff]   ;;  %v2483_v40 = vld [vmem:[%s3076_s1 + $0x148] sm:$0xff]   ;;  %s3054_s16 = scalar_lea.vmem %s3082_s7, %s1945_s11 }
  0x10   : > { %2085 = vmatprep.subr.bf16.mxu0 %v2452_v12  ;;  %v2467_v27 = vld [vmem:[%s3076_s1 + $0xb0] sm:$0xff]   ;;  %s2743_s22 = scalar_lea.vmem %s3075_s0, %s2431_s12  ;;  %v2474_v33 = vld [vmem:[%s3076_s1 + $0xb8] sm:$0xff]   ;;  %v2486_v42 = vld [vmem:[%s3076_s1 + $0x108] sm:$0xff]  }
  0x11   : > { %2148 = vmatpush3.bf16.msra.mxu1 %v2451_v11  ;;  %v2471_v31 = vld [vmem:[%s2743_s22] ss:$28 sps:$4 sm:$0xff]   ;;  %v2476_v35 = vld [vmem:[%s2743_s22 + $0x8] ss:$28 sps:$4 sm:$0xff]   ;;  %v2482_v39 = vld [vmem:[%s2743_s22 + $0x38] ss:$28 sps:$4 sm:$0xff]  }
  0x12   : > { %2149 = vmatprep.subr.bf16.mxu1 %v2454_v14  ;;  %v2473_v32 = vld [vmem:[%s2743_s22 + $0x4] ss:$28 sps:$4 sm:$0xff]   ;;  %v2478_v36 = vld [vmem:[%s2743_s22 + $0xc] ss:$28 sps:$4 sm:$0xff]   ;;  %v2480_v38 = vld [vmem:[%s2743_s22 + $0x3c] ss:$28 sps:$4 sm:$0xff]  }
  0x13   : > { %2086 = vmatpush3.bf16.msra.mxu0 %v2453_v13  ;;  %1125 = vmatprep.mubr.bf16.mxu0 %v2473_v32  ;;  %v2484_v41 = vld [vmem:[%s2743_s22 + $0x44] ss:$28 sps:$4 sm:$0xff]   ;;  %v2488_v44 = vld [vmem:[%s2743_s22 + $0x74] ss:$28 sps:$4 sm:$0xff]   ;;  %v2492_v46 = vld [vmem:[%s2743_s22 + $0x7c] ss:$28 sps:$4 sm:$0xff]  }
  0x14   : > { %2087 = vmatprep.subr.bf16.mxu0 %v2456_v16  ;;  %1222 = vmatprep.mubr.bf16.mxu1 %v2478_v36  ;;  %v2487_v43 = vld [vmem:[%s2743_s22 + $0x40] ss:$28 sps:$4 sm:$0xff]   ;;  %v2491_v45 = vld [vmem:[%s3076_s1 + $0x150] sm:$0xff]   ;;  %v2496_v49 = vld [vmem:[%s2743_s22 + $0xac] ss:$28 sps:$4 sm:$0xff]  }
  0x15   : > { %2150 = vmatpush3.bf16.msra.mxu1 %v2455_v15  ;;  %v2494_v47 = vld [vmem:[%s3076_s1 + $0x110] sm:$0xff]   ;;  %v2499_v50 = vld [vmem:[%s3076_s1 + $0x158] sm:$0xff]   ;;  %v2507_v54 = vld [vmem:[%s3076_s1 + $0x160] sm:$0xff]  }
  0x16   : > { %2151 = vmatprep.subr.bf16.mxu1 %v2458_v18  ;;  %v2490_v48 = vld [vmem:[%s2743_s22 + $0x70] ss:$28 sps:$4 sm:$0xff]   ;;  %v2495_v51 = vld [vmem:[%s2743_s22 + $0x78] ss:$28 sps:$4 sm:$0xff]   ;;  %v2498_v55 = vld [vmem:[%s2743_s22 + $0xa8] ss:$28 sps:$4 sm:$0xff]  }
  0x17   : > { %2088 = vmatpush3.bf16.msra.mxu0 %v2457_v17  ;;  %v2502_v52 = vld [vmem:[%s3076_s1 + $0x118] sm:$0xff]   ;;  %v2500_v53 = vld [vmem:[%s2743_s22 + $0xb4] ss:$28 sps:$4 sm:$0xff]   ;;  %v2510_v56 = vld [vmem:[%s3076_s1 + $0x120] sm:$0xff]  }
  0x18   : > { %2089 = vmatprep.subr.bf16.mxu0 %v2460_v20  ;;  %v2504_v57 = vld [vmem:[%s2743_s22 + $0xe4] ss:$28 sps:$4 sm:$0xff]   ;;  %v2503_v59 = vld [vmem:[%s2743_s22 + $0xb0] ss:$28 sps:$4 sm:$0xff]   ;;  %v2513_v3 = vld [vmem:[%s2743_s22 + $0x11c] ss:$28 sps:$4 sm:$0xff]  }
  0x19   : > { %2152 = vmatpush3.bf16.msra.mxu1 %v2459_v19  ;;  %v2512_v58 = vld [vmem:[%s3076_s1 + $0x180] sm:$0xff]   ;;  %v2508_v60 = vld [vmem:[%s2743_s22 + $0xec] ss:$28 sps:$4 sm:$0xff]   ;;  %v2522_v0 = vld [vmem:[%s3076_s1 + $0x190] sm:$0xff]  }
  0x1a   : > { %2153 = vmatprep.subr.bf16.mxu1 %v2462_v22  ;;  %v2516_v61 = vld [vmem:[%s3076_s1 + $0x168] sm:$0xff]   ;;  %v2506_v1 = vld [vmem:[%s2743_s22 + $0xe0] ss:$28 sps:$4 sm:$0xff]   ;;  %v2526_v4 = vld [vmem:[%s3076_s1 + $0x170] sm:$0xff]  }
  0x1b   : > { %2090 = vmatpush3.bf16.msra.mxu0 %v2461_v21  ;;  %v2517_v62 = vld [vmem:[%s3076_s1 + $0x188] sm:$0xff]   ;;  %v2527_v5 = vld [vmem:[%s3076_s1 + $0x198] sm:$0xff]   ;;  %v2518_v6 = vld [vmem:[%s2743_s22 + $0x124] ss:$28 sps:$4 sm:$0xff]  }
  0x1c   : > { %2091 = vmatprep.subr.bf16.mxu0 %v2464_v24  ;;  %v2520_v63 = vld [vmem:[%s3076_s1 + $0x128] sm:$0xff]   ;;  %v2530_v7 = vld [vmem:[%s3076_s1 + $0x130] sm:$0xff]   ;;  %v2532_v8 = vld [vmem:[%s3076_s1 + $0x1a0] sm:$0xff]  }
  0x1d   : > { %2154 = vmatpush3.bf16.msra.mxu1 %v2463_v23  ;;  %v2511_v2 = vld [vmem:[%s2743_s22 + $0xe8] ss:$28 sps:$4 sm:$0xff]   ;;  %v2515_v9 = vld [vmem:[%s2743_s22 + $0x118] ss:$28 sps:$4 sm:$0xff]   ;;  %v2521_v11 = vld [vmem:[%s2743_s22 + $0x120] ss:$28 sps:$4 sm:$0xff]  }
  0x1e   : > { %2155 = vmatprep.subr.bf16.mxu1 %v2466_v26  ;;  %v2536_v10 = vld [vmem:[%s3076_s1 + $0x178] sm:$0xff]   ;;  %v2523_v12 = vld [vmem:[%s2743_s22 + $0x154] ss:$28 sps:$4 sm:$0xff]   ;;  %v2537_v13 = vld [vmem:[%s3076_s1 + $0x1a8] sm:$0xff]  }
  0x1f   : > { %2092 = vmatpush3.bf16.msra.mxu0 %v2465_v25  ;;  %v2540_v14 = vld [vmem:[%s3076_s1 + $0x138] sm:$0xff]   ;;  %v2542_v16 = vld [vmem:[%s3076_s1 + $0x1b0] sm:$0xff]   ;;  %v2533_v18 = vld [vmem:[%s2743_s22 + $0x18c] ss:$28 sps:$4 sm:$0xff]  }
  0x20   : > { %2093 = vmatprep.subr.bf16.mxu0 %v2468_v28  ;;  %v2528_v15 = vld [vmem:[%s2743_s22 + $0x15c] ss:$28 sps:$4 sm:$0xff]   ;;  %v2525_v17 = vld [vmem:[%s2743_s22 + $0x150] ss:$28 sps:$4 sm:$0xff]   ;;  %v2535_v22 = vld [vmem:[%s2743_s22 + $0x188] ss:$28 sps:$4 sm:$0xff]  }
  0x21   : > { %2156 = vmatpush3.bf16.msra.mxu1 %v2467_v27  ;;  %v2546_v19 = vld [vmem:[%s3076_s1 + $0x1b8] sm:$0xff]   ;;  %v2538_v21 = vld [vmem:[%s2743_s22 + $0x194] ss:$28 sps:$4 sm:$0xff]   ;;  %v2549_v27 = vld [vmem:[%s2743_s22 + $0x4c] ss:$28 sps:$4 sm:$0xff]  }
  0x22   : > { %2157 = vmatprep.subr.bf16.mxu1 %v2470_v30  ;;  %v2531_v20 = vld [vmem:[%s2743_s22 + $0x158] ss:$28 sps:$4 sm:$0xff]   ;;  %v2541_v24 = vld [vmem:[%s2743_s22 + $0x190] ss:$28 sps:$4 sm:$0xff]   ;;  %v2551_v30 = vld [vmem:[%s2743_s22 + $0x48] ss:$28 sps:$4 sm:$0xff]  }
  0x23   : > { %2094 = vmatpush3.bf16.msra.mxu0 %v2469_v29  ;;  %v2545_v23 = vld [vmem:[%s2743_s22 + $0x14] ss:$28 sps:$4 sm:$0xff]   ;;  %v2555_v29 = vld [vmem:[%s2743_s22 + $0x88] ss:$28 sps:$4 sm:$0xff]   ;;  %v2556_v32 = vld [vmem:[%s2743_s22 + $0xc0] ss:$28 sps:$4 sm:$0xff]  }
  0x24   : > { %2207 = vmatprep.subr.bf16.mxu0 %v2475_v34  ;;  %v2547_v25 = vld [vmem:[%s2743_s22 + $0x18] ss:$28 sps:$4 sm:$0xff]   ;;  %v2543_v26 = vld [vmem:[%s2743_s22 + $0x10] ss:$28 sps:$4 sm:$0xff]   ;;  %v2554_v34 = vld [vmem:[%s2743_s22 + $0x80] ss:$28 sps:$4 sm:$0xff]  }
  0x25   : > { %2158 = vmatpush3.bf16.msra.mxu1 %v2474_v33  ;;  %v2548_v28 = vld [vmem:[%s2743_s22 + $0x50] ss:$28 sps:$4 sm:$0xff]   ;;  %v2563_v33 = vld [vmem:[%s2743_s22 + $0xf8] ss:$28 sps:$4 sm:$0xff]  }
  0x26   : > { %1126 = vmatmul.mubr.bf16.vlgmr.msra.gmra.mrb[0].mxu0 %v2471_v31  ;;  %2319 = vmatprep.subr.bf16.mxu1 %v2512_v58  ;;  %v2552_v31 = vld [vmem:[%s2743_s22 + $0x84] ss:$28 sps:$4 sm:$0xff]   ;;  %v2564_v36 = vld [vmem:[%s2743_s22 + $0x130] ss:$28 sps:$4 sm:$0xff]  }
  0x27   : > { %2208 = vmatpush3.bf16.msra.mxu0 %v2479_v37  ;;  %1133 = vmatprep.mubr.bf16.mxu0 %v2480_v38  ;;  %v2571_v37 = vld [vmem:[%s2743_s22 + $0x168] ss:$28 sps:$4 sm:$0xff]   ;;  %v2559_v38 = vld [vmem:[%s2743_s22 + $0xb8] ss:$28 sps:$4 sm:$0xff]  }
  0x28   : > { %1223 = vmatmul.mubr.bf16.vlgmr.msra.gmra.mrb[0].mxu1 %v2476_v35  ;;  %2209 = vmatprep.subr.bf16.mxu0 %v2483_v40  ;;  %v2557_v35 = vld [vmem:[%s2743_s22 + $0xbc] ss:$28 sps:$4 sm:$0xff]  }
  0x29   : > { %1230 = vmatprep.mubr.bf16.mxu1 %v2484_v41  ;;  %2320 = vmatpush3.bf16.msra.mxu1 %v2512_v58  ;;  %v2572_v40 = vld [vmem:[%s2743_s22 + $0x1a0] ss:$28 sps:$4 sm:$0xff]   ;;  %v2562_v41 = vld [vmem:[%s2743_s22 + $0xf0] ss:$28 sps:$4 sm:$0xff]  }
  0x2a   : > { %2321 = vmatprep.subr.bf16.mxu1 %v2517_v62 }
  0x2b   : > { %2210 = vmatpush3.bf16.msra.mxu0 %v2486_v42  ;;  %v2565_v42 = vld [vmem:[%s2743_s22 + $0x12c] ss:$28 sps:$4 sm:$0xff]  }
  0x2c   : > { %2211 = vmatprep.subr.bf16.mxu0 %v2491_v45  ;;  %v2570_v45 = vld [vmem:[%s2743_s22 + $0x160] ss:$28 sps:$4 sm:$0xff]  }
  0x2d   : > { %2322 = vmatpush3.bf16.msra.mxu1 %v2517_v62 }
  0x2e   : > { %1134 = vmatmul.mubr.bf16.gmra.mrb[4].mxu0 %v2482_v39  ;;  %2323 = vmatprep.subr.bf16.mxu1 %v2522_v0  ;;  %v2560_v39 = vld [vmem:[%s2743_s22 + $0xf4] ss:$28 sps:$4 sm:$0xff]  }
  0x2f   : > { %1141 = vmatprep.mubr.bf16.mxu0 %v2488_v44  ;;  %2212 = vmatpush3.bf16.msra.mxu0 %v2494_v47  ;;  %v2568_v44 = vld [vmem:[%s2743_s22 + $0x164] ss:$28 sps:$4 sm:$0xff]   ;;  %v2575_v47 = vld [vmem:[%s2743_s22 + $0x198] ss:$28 sps:$4 sm:$0xff]  }
  0x30   : > { %1231 = vmatmul.mubr.bf16.gmra.mrb[4].mxu1 %v2487_v43  ;;  %2213 = vmatprep.subr.bf16.mxu0 %v2499_v50  ;;  %v2567_v43 = vld [vmem:[%s2743_s22 + $0x128] ss:$28 sps:$4 sm:$0xff]   ;;  %v2578_v50 = vld [vmem:[%s3078_s3 + $0x10] sm:$0xff]  }
  0x31   : > { %1238 = vmatprep.mubr.bf16.mxu1 %v2492_v46  ;;  %2324 = vmatpush3.bf16.msra.mxu1 %v2522_v0  ;;  %v2573_v46 = vld [vmem:[%s2743_s22 + $0x19c] ss:$28 sps:$4 sm:$0xff]  }
  0x32   : > { %2325 = vmatprep.subr.bf16.mxu1 %v2527_v5 }
  0x33   : > { %2214 = vmatpush3.bf16.msra.mxu0 %v2502_v52  ;;  %v2580_v52 = vld [vmem:[%s3078_s3 + $0x20] sm:$0xff]  }
  0x34   : > { %2215 = vmatprep.subr.bf16.mxu0 %v2507_v54  ;;  %v2582_v54 = vld [vmem:[%s3078_s3 + $0x30] sm:$0xff]  }
  0x35   : > { %2326 = vmatpush3.bf16.msra.mxu1 %v2527_v5 }
  0x36   : > { %1142 = vmatmul.mubr.bf16.gmra.mrb[8].mxu0 %v2490_v48  ;;  %2327 = vmatprep.subr.bf16.mxu1 %v2532_v8  ;;  %v2576_v48 = vld [vmem:[%s3078_s3] sm:$0xff]  }
  0x37   : > { %1149 = vmatprep.mubr.bf16.mxu0 %v2496_v49  ;;  %2216 = vmatpush3.bf16.msra.mxu0 %v2510_v56  ;;  %v2577_v49 = vld [vmem:[%s3078_s3 + $0x8] sm:$0xff]  }
  0x38   : > { %1239 = vmatmul.mubr.bf16.gmra.mrb[8].mxu1 %v2495_v51  ;;  %2217 = vmatprep.subr.bf16.mxu0 %v2516_v61  ;;  %v2579_v51 = vld [vmem:[%s3078_s3 + $0x18] sm:$0xff]  }
  0x39   : > { %1246 = vmatprep.mubr.bf16.mxu1 %v2500_v53  ;;  %2328 = vmatpush3.bf16.msra.mxu1 %v2532_v8  ;;  %v2581_v53 = vld [vmem:[%s3078_s3 + $0x28] sm:$0xff]  }
  0x3a   : > { %2329 = vmatprep.subr.bf16.mxu1 %v2537_v13 }
  0x3b   : > { %2218 = vmatpush3.bf16.msra.mxu0 %v2520_v63 }
  0x3c   : > { %2219 = vmatprep.subr.bf16.mxu0 %v2526_v4 }
  0x3d   : > { %2330 = vmatpush3.bf16.msra.mxu1 %v2537_v13 }
  0x3e   : > { %1150 = vmatmul.mubr.bf16.gmra.mrb[12].mxu0 %v2498_v55  ;;  %2331 = vmatprep.subr.bf16.mxu1 %v2542_v16  ;;  %v2583_v55 = vld [vmem:[%s3078_s3 + $0x38] sm:$0xff]  }
  0x3f   : > { %1157 = vmatprep.mubr.bf16.mxu0 %v2504_v57  ;;  %2220 = vmatpush3.bf16.msra.mxu0 %v2530_v7  ;;  %v2909_v57 = vld [vmem:[%s3077_s2] ss:$0 sm:$0xff]  ;;  %v2921_v7 = vld [vmem:[%s3080_s5 + $0x8] sm:$0xff]  }
  0x40   : > { %1247 = vmatmul.mubr.bf16.gmra.mrb[12].mxu1 %v2503_v59  ;;  %2221 = vmatprep.subr.bf16.mxu0 %v2536_v10 }
  0x41   : > { %1254 = vmatprep.mubr.bf16.mxu1 %v2508_v60  ;;  %2332 = vmatpush3.bf16.msra.mxu1 %v2542_v16 }
  0x42   : > { %2333 = vmatprep.subr.bf16.mxu1 %v2546_v19 }
  0x43   : > { %2222 = vmatpush3.bf16.msra.mxu0 %v2540_v14 }
  0x45   : > { %2334 = vmatpush3.bf16.msra.mxu1 %v2546_v19 }
  0x46   : > { %1158 = vmatmul.mubr.bf16.gmra.mrb[16].mxu0 %v2506_v1  ;;  %2351 = vmatprep.subr.bf16.mxu1 %v2576_v48 }
  0x47   : > { %1165 = vmatprep.mubr.bf16.mxu0 %v2513_v3 }
  0x48   : > { %1255 = vmatmul.mubr.bf16.gmra.mrb[16].mxu1 %v2511_v2 }
  0x49   : > { %1262 = vmatprep.mubr.bf16.mxu1 %v2518_v6  ;;  %v2916_v6 = vld [vmem:[%s3080_s5] sm:$0xff]  }
  0x4a   : > { %2383 = vmatprep.subr.bf16.mxu0 %v2916_v6 }
  0x4e   : > { %1166 = vmatmul.mubr.bf16.gmra.mrb[20].mxu0 %v2515_v9 }
  0x4f   : > { %1173 = vmatprep.mubr.bf16.mxu0 %v2523_v12 }
  0x50   : > { %1263 = vmatmul.mubr.bf16.gmra.mrb[20].mxu1 %v2521_v11 }
  0x51   : > { %1270 = vmatprep.mubr.bf16.mxu1 %v2528_v15  ;;  %v2934_v15 = vld [vmem:[%s3080_s5 + $0x10] sm:$0xff]  }
  0x56   : > { %1174 = vmatmul.mubr.bf16.gmra.mrb[24].mxu0 %v2525_v17 }
  0x57   : > { %1181 = vmatprep.mubr.bf16.mxu0 %v2533_v18 }
  0x58   : > { %1271 = vmatmul.mubr.bf16.gmra.mrb[24].mxu1 %v2531_v20 }
  0x59   : > { %1278 = vmatprep.mubr.bf16.mxu1 %v2538_v21 }
  0x5e   : > { %1182 = vmatmul.mubr.bf16.gmra.mrb[28].mxu0 %v2535_v22 }
  0x5f   : > { %1319 = vmatprep.mubr.bf16.mxu0 %v2545_v23 }
  0x60   : > { %1279 = vmatmul.mubr.bf16.gmra.mrb[28].mxu1 %v2541_v24 }
  0x61   : > { %2335 = vmatprep.mubr.bf16.mxu1 %v2547_v25  ;;  %v2943_v25 = vld [vmem:[%s3080_s5 + $0x18] sm:$0xff]  }
  0x66   : > { %1320 = vmatmul.mubr.bf16.vlgmr.msra.gmra.mrb[32].mxu0 %v2543_v26 }
  0x67   : > { %1327 = vmatprep.mubr.bf16.mxu0 %v2549_v27  ;;  %2384 = vmatpush3.bf16.msra.mxu0 %v2916_v6 }
  0x68   : > { %2336 = vmatmul.mubr.bf16.vlgmr.msra.gmra.mrb[32].mxu1 %v2548_v28  ;;  %2385 = vmatprep.subr.bf16.mxu0 %v2921_v7 }
  0x69   : > { %2339 = vmatprep.mubr.bf16.mxu1 %v2555_v29  ;;  %2352 = vmatpush3.bf16.msra.mxu1 %v2576_v48 }
  0x6a   : > { %2353 = vmatprep.subr.bf16.mxu1 %v2577_v49 }
  0x6b   : > { %2386 = vmatpush3.bf16.msra.mxu0 %v2921_v7 }
  0x6c   : > { %2387 = vmatprep.subr.bf16.mxu0 %v2934_v15 }
  0x6d   : > { %2354 = vmatpush3.bf16.msra.mxu1 %v2577_v49 }
  0x6e   : > { %1328 = vmatmul.mubr.bf16.gmra.mrb[36].mxu0 %v2551_v30  ;;  %2355 = vmatprep.subr.bf16.mxu1 %v2578_v50 }
  0x6f   : > { %1335 = vmatprep.mubr.bf16.mxu0 %v2552_v31  ;;  %2388 = vmatpush3.bf16.msra.mxu0 %v2934_v15 }
  0x70   : > { %2340 = vmatmul.mubr.bf16.gmra.mrb[36].mxu1 %v2556_v32  ;;  %2389 = vmatprep.subr.bf16.mxu0 %v2943_v25 }
  0x71   : > { %2343 = vmatprep.mubr.bf16.mxu1 %v2563_v33  ;;  %2356 = vmatpush3.bf16.msra.mxu1 %v2578_v50  ;;  %v2954_v33 = vld [vmem:[%s3080_s5 + $0x20] sm:$0xff]  }
  0x72   : > { %2357 = vmatprep.subr.bf16.mxu1 %v2579_v51 }
  0x73   : > { %2390 = vmatpush3.bf16.msra.mxu0 %v2943_v25 }
  0x74   : > { %2391 = vmatprep.subr.bf16.mxu0 %v2954_v33 }
  0x75   : > { %2358 = vmatpush3.bf16.msra.mxu1 %v2579_v51 }
  0x76   : > { %1336 = vmatmul.mubr.bf16.gmra.mrb[40].mxu0 %v2554_v34  ;;  %2359 = vmatprep.subr.bf16.mxu1 %v2580_v52 }
  0x77   : > { %1343 = vmatprep.mubr.bf16.mxu0 %v2557_v35  ;;  %2392 = vmatpush3.bf16.msra.mxu0 %v2954_v33 }
  0x78   : > { %2344 = vmatmul.mubr.bf16.gmra.mrb[40].mxu1 %v2564_v36 }
  0x79   : > { %2347 = vmatprep.mubr.bf16.mxu1 %v2571_v37  ;;  %2360 = vmatpush3.bf16.msra.mxu1 %v2580_v52 }
  0x7a   : > { %2361 = vmatprep.subr.bf16.mxu1 %v2581_v53 }
  0x7d   : > { %2362 = vmatpush3.bf16.msra.mxu1 %v2581_v53 }
  0x7e   : > { %1344 = vmatmul.mubr.bf16.gmra.mrb[44].mxu0 %v2559_v38  ;;  %2363 = vmatprep.subr.bf16.mxu1 %v2582_v54 }
  0x7f   : > { %1351 = vmatprep.mubr.bf16.mxu0 %v2560_v39 }
  0x80   : > { %2348 = vmatmul.mubr.bf16.gmra.mrb[44].mxu1 %v2572_v40 }
  0x81   : > { %2364 = vmatpush3.bf16.msra.mxu1 %v2582_v54 }
  0x82   : > { %2365 = vmatprep.subr.bf16.mxu1 %v2583_v55 }
  0x85   : > { %2366 = vmatpush3.bf16.msra.mxu1 %v2583_v55 }
  0x86   : > { %1352 = vmatmul.mubr.bf16.gmra.mrb[48].mxu0 %v2562_v41  ;;  %2415 = vmatprep.subr.bf16.mxu1 %v2916_v6 }
  0x87   : > { %1359 = vmatprep.mubr.bf16.mxu0 %v2565_v42 }
  0x8e   : > { %1360 = vmatmul.mubr.bf16.gmra.mrb[52].mxu0 %v2567_v43  ;;  %v2963_v43 = vld [vmem:[%s3080_s5 + $0x28] sm:$0xff]  }
  0x8f   : > { %1367 = vmatprep.mubr.bf16.mxu0 %v2568_v44  ;;  %2393 = vmatprep.subr.bf16.mxu0 %v2963_v43 }
  0x90   : > { %2394 = vmatpush3.bf16.msra.mxu0 %v2963_v43 }
  0x96   : > { %1368 = vmatmul.mubr.bf16.gmra.mrb[56].mxu0 %v2570_v45 }
  0x97   : > { %1375 = vmatprep.mubr.bf16.mxu0 %v2573_v46 }
  0x9e   : > { %1376 = vmatmul.mubr.bf16.gmra.mrb[60].mxu0 %v2575_v47 }
  0xf9   : > { %v2095_v56 = vpop.f32.mrb[0].mxu0 }
  0xfa   : > { %v2096_v58 = vpop.f32.mrb[1].mxu0 }
  0xfb   : > { %v2097_v59 = vadd.f32 %v2096_v58, %v2095_v56  ;;  %v2098_v60 = vpop.f32.mrb[2].mxu0  ;;  %v2159_v61 = vpop.f32.mrb[0].mxu1 }
  0xfc   : > { %v2099_v62 = vpop.f32.mrb[3].mxu0  ;;  %v2160_v1 = vpop.f32.mrb[1].mxu1 }
  0xfd   : > { %v1128_v63 = vadd.f32 %v2097_v59, %v2909_v57  ;;  %v2100_v0 = vadd.f32 %v2099_v62, %v2098_v60  ;;  %v2161_v2 = vadd.f32 %v2160_v1, %v2159_v61  ;;  %v2162_v3 = vpop.f32.mrb[2].mxu1 }
  0xfe   : > { %v2163_v5 = vpop.f32.mrb[3].mxu1 }
  0xff   : > { %v1131_v4 = vadd.f32 %v2100_v0, %v2909_v57  ;;  %v2923_v8 = vadd.f32 %v2161_v2, %v1128_v63  ;;  %v2164_v9 = vadd.f32 %v2163_v5, %v2162_v3 }
 0x101   : > { %v2101_v10 = vpop.f32.mrb[4].mxu0  ;;  %v2927_v11 = vadd.f32 %v2164_v9, %v1131_v4 }
 0x102   : > { %v2102_v12 = vpop.f32.mrb[5].mxu0 }
 0x103   : > { %v2103_v13 = vadd.f32 %v2102_v12, %v2101_v10  ;;  %v2104_v14 = vpop.f32.mrb[6].mxu0  ;;  %v2165_v16 = vpop.f32.mrb[4].mxu1 }
 0x104   : > { %v2105_v17 = vpop.f32.mrb[7].mxu0  ;;  %v2166_v20 = vpop.f32.mrb[5].mxu1 }
 0x105   : > { %v1136_v18 = vadd.f32 %v2103_v13, %v2909_v57  ;;  %v2106_v19 = vadd.f32 %v2105_v17, %v2104_v14  ;;  %v2167_v21 = vadd.f32 %v2166_v20, %v2165_v16  ;;  %v2168_v22 = vpop.f32.mrb[6].mxu1 }
 0x106   : > { %v2169_v24 = vpop.f32.mrb[7].mxu1 }
 0x107   : > { %v1139_v23 = vadd.f32 %v2106_v19, %v2909_v57  ;;  %v2945_v26 = vadd.f32 %v2167_v21, %v1136_v18  ;;  %v2170_v27 = vadd.f32 %v2169_v24, %v2168_v22 }
 0x109   : > { %v2107_v28 = vpop.f32.mrb[8].mxu0  ;;  %v2947_v29 = vadd.f32 %v2170_v27, %v1139_v23 }
 0x10a   : > { %v2108_v30 = vpop.f32.mrb[9].mxu0 }
 0x10b   : > { %v2109_v31 = vadd.f32 %v2108_v30, %v2107_v28  ;;  %v2110_v32 = vpop.f32.mrb[10].mxu0  ;;  %v2171_v34 = vpop.f32.mrb[8].mxu1 }
 0x10c   : > { %v2111_v35 = vpop.f32.mrb[11].mxu0  ;;  %v2172_v38 = vpop.f32.mrb[9].mxu1 }
 0x10d   : > { %v1144_v36 = vadd.f32 %v2109_v31, %v2909_v57  ;;  %v2112_v37 = vadd.f32 %v2111_v35, %v2110_v32  ;;  %v2173_v39 = vadd.f32 %v2172_v38, %v2171_v34  ;;  %v2174_v40 = vpop.f32.mrb[10].mxu1 }
 0x10e   : > { %v2175_v42 = vpop.f32.mrb[11].mxu1 }
 0x10f   : > { %v1147_v41 = vadd.f32 %v2112_v37, %v2909_v57  ;;  %v2965_v44 = vadd.f32 %v2173_v39, %v1144_v36  ;;  %v2176_v45 = vadd.f32 %v2175_v42, %v2174_v40 }
 0x111   : > { %v2113_v46 = vpop.f32.mrb[12].mxu0  ;;  %v2967_v47 = vadd.f32 %v2176_v45, %v1147_v41 }
 0x112   : > { %v2114_v48 = vpop.f32.mrb[13].mxu0 }
 0x113   : > { %v2115_v49 = vadd.f32 %v2114_v48, %v2113_v46  ;;  %v2116_v50 = vpop.f32.mrb[14].mxu0  ;;  %v2177_v51 = vpop.f32.mrb[12].mxu1 }
 0x114   : > { %v2117_v52 = vpop.f32.mrb[15].mxu0  ;;  %v2178_v55 = vpop.f32.mrb[13].mxu1 }
 0x115   : > { %v1152_v53 = vadd.f32 %v2115_v49, %v2909_v57  ;;  %v2118_v54 = vadd.f32 %v2117_v52, %v2116_v50  ;;  %v2179_v56 = vadd.f32 %v2178_v55, %v2177_v51  ;;  %v2180_v58 = vpop.f32.mrb[14].mxu1 }
 0x116   : > { %v2181_v60 = vpop.f32.mrb[15].mxu1 }
 0x117   : > { %v1155_v59 = vadd.f32 %v2118_v54, %v2909_v57  ;;  %v2974_v61 = vadd.f32 %v2179_v56, %v1152_v53  ;;  %v2182_v62 = vadd.f32 %v2181_v60, %v2180_v58 }
 0x119   : > { %v2119_v63 = vpop.f32.mrb[16].mxu0  ;;  %v2976_v0 = vadd.f32 %v2182_v62, %v1155_v59 }
 0x11a   : > { %v2120_v1 = vpop.f32.mrb[17].mxu0 }
 0x11b   : > { %v2121_v2 = vadd.f32 %v2120_v1, %v2119_v63  ;;  %v2122_v3 = vpop.f32.mrb[18].mxu0  ;;  %v2183_v4 = vpop.f32.mrb[16].mxu1 }
 0x11c   : > { %v2123_v5 = vpop.f32.mrb[19].mxu0  ;;  %v2184_v12 = vpop.f32.mrb[17].mxu1 }
 0x11d   : > { %v1160_v9 = vadd.f32 %v2121_v2, %v2909_v57  ;;  %v2124_v10 = vadd.f32 %v2123_v5, %v2122_v3  ;;  %v2185_v13 = vadd.f32 %v2184_v12, %v2183_v4  ;;  %v2186_v14 = vpop.f32.mrb[18].mxu1 }
 0x11e   : > { %v2187_v17 = vpop.f32.mrb[19].mxu1 }
 0x11f   : > { %v1163_v16 = vadd.f32 %v2124_v10, %v2909_v57  ;;  %v2980_v18 = vadd.f32 %v2185_v13, %v1160_v9  ;;  %v2188_v19 = vadd.f32 %v2187_v17, %v2186_v14 }
 0x121   : > { %v2125_v20 = vpop.f32.mrb[20].mxu0  ;;  %v2982_v21 = vadd.f32 %v2188_v19, %v1163_v16 }
 0x122   : > { %v2126_v22 = vpop.f32.mrb[21].mxu0 }
 0x123   : > { %v2127_v23 = vadd.f32 %v2126_v22, %v2125_v20  ;;  %v2128_v24 = vpop.f32.mrb[22].mxu0  ;;  %v2189_v27 = vpop.f32.mrb[20].mxu1 }
 0x124   : > { %v2129_v28 = vpop.f32.mrb[23].mxu0  ;;  %v2190_v32 = vpop.f32.mrb[21].mxu1 }
 0x125   : > { %v1168_v30 = vadd.f32 %v2127_v23, %v2909_v57  ;;  %v2130_v31 = vadd.f32 %v2129_v28, %v2128_v24  ;;  %v2191_v34 = vadd.f32 %v2190_v32, %v2189_v27  ;;  %v2192_v35 = vpop.f32.mrb[22].mxu1 }
 0x126   : > { %v2193_v37 = vpop.f32.mrb[23].mxu1 }
 0x127   : > { %v1171_v36 = vadd.f32 %v2130_v31, %v2909_v57  ;;  %v2986_v38 = vadd.f32 %v2191_v34, %v1168_v30  ;;  %v2194_v39 = vadd.f32 %v2193_v37, %v2192_v35 }
 0x129   : > { %v2131_v40 = vpop.f32.mrb[24].mxu0  ;;  %v2988_v41 = vadd.f32 %v2194_v39, %v1171_v36 }
 0x12a   : > { %v2132_v42 = vpop.f32.mrb[25].mxu0 }
 0x12b   : > { %v2133_v45 = vadd.f32 %v2132_v42, %v2131_v40  ;;  %v2134_v46 = vpop.f32.mrb[26].mxu0  ;;  %v2195_v48 = vpop.f32.mrb[24].mxu1 }
 0x12c   : > { %v2135_v49 = vpop.f32.mrb[27].mxu0  ;;  %v2196_v52 = vpop.f32.mrb[25].mxu1 }
 0x12d   : > { %v1176_v50 = vadd.f32 %v2133_v45, %v2909_v57  ;;  %v2136_v51 = vadd.f32 %v2135_v49, %v2134_v46  ;;  %v2197_v53 = vadd.f32 %v2196_v52, %v2195_v48  ;;  %v2198_v54 = vpop.f32.mrb[26].mxu1 }
 0x12e   : > { %v2199_v56 = vpop.f32.mrb[27].mxu1 }
 0x12f   : > { %v1179_v55 = vadd.f32 %v2136_v51, %v2909_v57  ;;  %v2992_v58 = vadd.f32 %v2197_v53, %v1176_v50  ;;  %v2200_v59 = vadd.f32 %v2199_v56, %v2198_v54 }
 0x131   : > { %v2137_v60 = vpop.f32.mrb[28].mxu0  ;;  %v2994_v62 = vadd.f32 %v2200_v59, %v1179_v55 }
 0x132   : > { %v2138_v63 = vpop.f32.mrb[29].mxu0 }
 0x133   : > { %v2139_v1 = vadd.f32 %v2138_v63, %v2137_v60  ;;  %v2140_v2 = vpop.f32.mrb[30].mxu0  ;;  %v2201_v3 = vpop.f32.mrb[28].mxu1 }
 0x134   : > { %v2141_v4 = vpop.f32.mrb[31].mxu0  ;;  %v2202_v10 = vpop.f32.mrb[29].mxu1 }
 0x135   : > { %v1184_v5 = vadd.f32 %v2139_v1, %v2909_v57  ;;  %v2142_v9 = vadd.f32 %v2141_v4, %v2140_v2  ;;  %v2203_v12 = vadd.f32 %v2202_v10, %v2201_v3  ;;  %v2204_v13 = vpop.f32.mrb[30].mxu1 }
 0x136   : > { %v2205_v16 = vpop.f32.mrb[31].mxu1 }
 0x137   : > { %v1187_v14 = vadd.f32 %v2142_v9, %v2909_v57  ;;  %v2998_v17 = vadd.f32 %v2203_v12, %v1184_v5  ;;  %v2206_v19 = vadd.f32 %v2205_v16, %v2204_v13 }
 0x139   : > { %v2223_v20 = vpop.f32.mrb[32].mxu0  ;;  %v3000_v22 = vadd.f32 %v2206_v19, %v1187_v14 }
 0x13a   : > { %v2224_v23 = vpop.f32.mrb[33].mxu0 }
 0x13b   : > { %v2225_v24 = vadd.f32 %v2224_v23, %v2223_v20  ;;  %v2226_v27 = vpop.f32.mrb[34].mxu0  ;;  %v2337_v30 = vpop.f32.mrb[32].mxu1 }
 0x13c   : > { %v2227_v28 = vpop.f32.mrb[35].mxu0  ;;  %v1418_v34 = vpop.f32.mrb[33].mxu1 }
 0x13d   : > { %v2228_v31 = vadd.f32 %v2227_v28, %v2226_v27  ;;  %v1322_v32 = vadd.f32 %v2225_v24, %v2923_v8  ;;  %v2338_v35 = vpop.f32.mrb[34].mxu1 }
 0x13e   : > { %v1421_v37 = vpop.f32.mrb[35].mxu1 }
 0x13f   : > { %v1419_v36 = vadd.f32 %v1418_v34, %v1322_v32  ;;  %v1325_v57 = vadd.f32 %v2228_v31, %v2927_v11 }
 0x141   : > { %v1422_v39 = vadd.f32 %v1421_v37, %v1325_v57  ;;  %v2229_v40 = vpop.f32.mrb[36].mxu0  ;;  %v1481_v45 = vmax.f32 %v1419_v36, 0.0 }
 0x142   : > { %v2230_v42 = vpop.f32.mrb[37].mxu0 }
 0x143   : > { %v1482_v46 = vmax.f32 %v1422_v39, 0.0  ;;  %v2231_v48 = vadd.f32 %v2230_v42, %v2229_v40  ;;  %v2232_v49 = vpop.f32.mrb[38].mxu0  ;;  %v2341_v51 = vpop.f32.mrb[36].mxu1 }
 0x144   : > { %v2233_v50 = vpop.f32.mrb[39].mxu0  ;;  %v1434_v8 = vpop.f32.mrb[37].mxu1 }
 0x145   : > { %v1497_v52 = vpack.c.bf16 %v1482_v46, %v1481_v45  ;;  %v1330_v53 = vadd.f32 %v2231_v48, %v2945_v26  ;;  %v2234_v54 = vadd.f32 %v2233_v50, %v2232_v49  ;;  %v2342_v55 = vpop.f32.mrb[38].mxu1 }
 0x146   : > { %v1437_v11 = vpop.f32.mrb[39].mxu1 }
 0x147   : > { %v1427_v56 = vadd.f32 %v2337_v30, %v1330_v53  ;;  %v1333_v59 = vadd.f32 %v2234_v54, %v2947_v29  ;;  %2367 = vmatprep.mubr.bf16.mxu1 %v1497_v52 }
 0x149   : > { %v1430_v60 = vadd.f32 %v2338_v35, %v1333_v59  ;;  %v2235_v63 = vpop.f32.mrb[40].mxu0  ;;  %v1483_v2 = vmax.f32 %v1427_v56, 0.0 }
 0x14a   : > { %v2236_v1 = vpop.f32.mrb[41].mxu0 }
 0x14b   : > { %v1484_v3 = vmax.f32 %v1430_v60, 0.0  ;;  %v2237_v4 = vadd.f32 %v2236_v1, %v2235_v63  ;;  %v2238_v5 = vpop.f32.mrb[42].mxu0  ;;  %v3006_v10 = vpop.f32.mrb[40].mxu1 }
 0x14c   : > { %v2239_v9 = vpop.f32.mrb[43].mxu0  ;;  %v1450_v14 = vpop.f32.mrb[41].mxu1 }
 0x14d   : > { %v1498_v12 = vpack.c.bf16 %v1484_v3, %v1483_v2  ;;  %v2240_v26 = vadd.f32 %v2239_v9, %v2238_v5  ;;  %v1338_v13 = vadd.f32 %v2237_v4, %v2965_v44  ;;  %v2346_v16 = vpop.f32.mrb[42].mxu1 }
 0x14e   : > { %v1453_v20 = vpop.f32.mrb[43].mxu1 }
 0x14f   : > { %v1435_v19 = vadd.f32 %v1434_v8, %v1338_v13  ;;  %2368 = vmatmul.mubr.bf16.vlgmr.msra.gmra.mrb[48].mxu1 %v1498_v12  ;;  %v1341_v29 = vadd.f32 %v2240_v26, %v2967_v47 }
 0x150   : > { %2423 = vmatpush3.bf16.msra.mxu1 %v2916_v6 }
 0x151   : > { %v1438_v23 = vadd.f32 %v1437_v11, %v1341_v29  ;;  %v2241_v24 = vpop.f32.mrb[44].mxu0  ;;  %2416 = vmatprep.subr.bf16.mxu1 %v2921_v7  ;;  %v1485_v28 = vmax.f32 %v1435_v19, 0.0 }
 0x152   : > { %v2242_v27 = vpop.f32.mrb[45].mxu0 }
 0x153   : > { %v1486_v30 = vmax.f32 %v1438_v23, 0.0  ;;  %v2243_v31 = vadd.f32 %v2242_v27, %v2241_v24  ;;  %v2244_v32 = vpop.f32.mrb[46].mxu0  ;;  %v3012_v44 = vpop.f32.mrb[44].mxu1 }
 0x154   : > { %v2245_v34 = vpop.f32.mrb[47].mxu0  ;;  %2424 = vmatpush3.bf16.msra.mxu1 %v2921_v7  ;;  %v1466_v57 = vpop.f32.mrb[45].mxu1 }
 0x155   : > { %v1499_v35 = vpack.c.bf16 %v1486_v30, %v1485_v28  ;;  %v1346_v47 = vadd.f32 %v2243_v31, %v2974_v61  ;;  %v2246_v36 = vadd.f32 %v2245_v34, %v2244_v32  ;;  %2417 = vmatprep.subr.bf16.mxu1 %v2934_v15  ;;  %v3017_v6 = vpop.f32.mrb[46].mxu1 }
 0x156   : > { %v1469_v40 = vpop.f32.mrb[47].mxu1 }
 0x157   : > { %v1443_v37 = vadd.f32 %v2341_v51, %v1346_v47  ;;  %v1349_v39 = vadd.f32 %v2246_v36, %v2976_v0  ;;  %2371 = vmatprep.mubr.bf16.mxu1 %v1499_v35 }
 0x158   : > { %2425 = vmatpush3.bf16.msra.mxu1 %v2934_v15 }
 0x159   : > { %v1446_v42 = vadd.f32 %v2342_v55, %v1349_v39  ;;  %v2247_v45 = vpop.f32.mrb[48].mxu0  ;;  %2418 = vmatprep.subr.bf16.mxu1 %v2943_v25  ;;  %v1487_v46 = vmax.f32 %v1443_v37, 0.0 }
 0x15a   : > { %v2248_v7 = vpop.f32.mrb[49].mxu0 }
 0x15b   : > { %v1488_v61 = vmax.f32 %v1446_v42, 0.0  ;;  %v2249_v48 = vadd.f32 %v2248_v7, %v2247_v45  ;;  %v2250_v49 = vpop.f32.mrb[50].mxu0 }
 0x15c   : > { %v2251_v50 = vpop.f32.mrb[51].mxu0  ;;  %2426 = vmatpush3.bf16.msra.mxu1 %v2943_v25 }
 0x15d   : > { %v2252_v52 = vadd.f32 %v2251_v50, %v2250_v49  ;;  %v1354_v51 = vadd.f32 %v2249_v48, %v2980_v18  ;;  %v1500_v0 = vpack.c.bf16 %v1488_v61, %v1487_v46  ;;  %2419 = vmatprep.subr.bf16.mxu1 %v2954_v33 }
 0x15f   : > { %v1451_v53 = vadd.f32 %v1450_v14, %v1354_v51  ;;  %2372 = vmatmul.mubr.bf16.gmra.mrb[52].mxu1 %v1500_v0  ;;  %v1357_v15 = vadd.f32 %v2252_v52, %v2982_v21 }
 0x160   : > { %2427 = vmatpush3.bf16.msra.mxu1 %v2954_v33 }
 0x161   : > { %v1454_v54 = vadd.f32 %v1453_v20, %v1357_v15  ;;  %v2253_v8 = vpop.f32.mrb[52].mxu0  ;;  %2420 = vmatprep.subr.bf16.mxu1 %v2963_v43  ;;  %v1489_v56 = vmax.f32 %v1451_v53, 0.0 }
 0x162   : > { %v2254_v55 = vpop.f32.mrb[53].mxu0 }
 0x163   : > { %v1490_v59 = vmax.f32 %v1454_v54, 0.0  ;;  %v2255_v25 = vadd.f32 %v2254_v55, %v2253_v8  ;;  %v2256_v11 = vpop.f32.mrb[54].mxu0 }
 0x164   : > { %v2257_v60 = vpop.f32.mrb[55].mxu0  ;;  %2428 = vmatpush3.bf16.msra.mxu1 %v2963_v43 }
 0x165   : > { %v1501_v18 = vpack.c.bf16 %v1490_v59, %v1489_v56  ;;  %v1362_v63 = vadd.f32 %v2255_v25, %v2986_v38  ;;  %v2258_v1 = vadd.f32 %v2257_v60, %v2256_v11 }
 0x167   : > { %v1459_v21 = vadd.f32 %v3006_v10, %v1362_v63  ;;  %v1365_v33 = vadd.f32 %v2258_v1, %v2988_v41  ;;  %2375 = vmatprep.mubr.bf16.mxu1 %v1501_v18 }
 0x169   : > { %v1462_v2 = vadd.f32 %v2346_v16, %v1365_v33  ;;  %v2259_v3 = vpop.f32.mrb[56].mxu0  ;;  %v1491_v5 = vmax.f32 %v1459_v21, 0.0 }
 0x16a   : > { %v2260_v4 = vpop.f32.mrb[57].mxu0 }
 0x16b   : > { %v1492_v9 = vmax.f32 %v1462_v2, 0.0  ;;  %v2261_v12 = vadd.f32 %v2260_v4, %v2259_v3  ;;  %v2262_v26 = vpop.f32.mrb[58].mxu0 }
 0x16c   : > { %v2263_v13 = vpop.f32.mrb[59].mxu0 }
 0x16d   : > { %v2264_v14 = vadd.f32 %v2263_v13, %v2262_v26  ;;  %v1370_v43 = vadd.f32 %v2261_v12, %v2992_v58  ;;  %v1502_v19 = vpack.c.bf16 %v1492_v9, %v1491_v5 }
 0x16f   : > { %v1467_v29 = vadd.f32 %v1466_v57, %v1370_v43  ;;  %2376 = vmatmul.mubr.bf16.gmra.mrb[56].mxu1 %v1502_v19  ;;  %v1373_v38 = vadd.f32 %v2264_v14, %v2994_v62  ;;  %v2590_v57 = vld [vmem:[%s3080_s5 + $0x30] sm:$0xff]  }
 0x170   : > { %2395 = vmatprep.subr.bf16.mxu0 %v2590_v57  ;;  %2421 = vmatprep.subr.bf16.mxu1 %v2590_v57 }
 0x171   : > { %v1470_v10 = vadd.f32 %v1469_v40, %v1373_v38  ;;  %v2265_v20 = vpop.f32.mrb[60].mxu0  ;;  %v1493_v23 = vmax.f32 %v1467_v29, 0.0  ;;  %2396 = vmatpush3.bf16.msra.mxu0 %v2590_v57  ;;  %2429 = vmatpush3.bf16.msra.mxu1 %v2590_v57 }
 0x172   : > { %v2266_v41 = vpop.f32.mrb[61].mxu0 }
 0x173   : > { %v1494_v16 = vmax.f32 %v1470_v10, 0.0  ;;  %v2267_v24 = vadd.f32 %v2266_v41, %v2265_v20  ;;  %v2268_v27 = vpop.f32.mrb[62].mxu0 }
 0x174   : > { %v2269_v28 = vpop.f32.mrb[63].mxu0 }
 0x175   : > { %v1503_v30 = vpack.c.bf16 %v1494_v16, %v1493_v23  ;;  %v1378_v31 = vadd.f32 %v2267_v24, %v2998_v17  ;;  %v2270_v32 = vadd.f32 %v2269_v28, %v2268_v27  ;;  %v2591_v17 = vld [vmem:[%s3080_s5 + $0x38] sm:$0xff]  }
 0x176   : > { %2397 = vmatprep.subr.bf16.mxu0 %v2591_v17  ;;  %2422 = vmatprep.subr.bf16.mxu1 %v2591_v17 }
 0x177   : > { %v1475_v34 = vadd.f32 %v3012_v44, %v1378_v31  ;;  %v1381_v58 = vadd.f32 %v2270_v32, %v3000_v22  ;;  %2379 = vmatprep.mubr.bf16.mxu1 %v1503_v30  ;;  %2398 = vmatpush3.bf16.msra.mxu0 %v2591_v17  ;;  %v2059_v22 = vld [vmem:[%s3079_s4] ss:$0 sm:$0xff] }
 0x178   : > { %2430 = vmatpush3.bf16.msra.mxu1 %v2591_v17 }
 0x179   : > { %v1478_v35 = vadd.f32 %v3017_v6, %v1381_v58  ;;  %v1495_v62 = vmax.f32 %v1475_v34, 0.0  ;;  %v2068_v58 = vld [vmem:[%s3081_s6] ss:$0 sm:$0xff] }
 0x17b   : > { %v1496_v47 = vmax.f32 %v1478_v35, 0.0 }
 0x17d   : > { %v1504_v36 = vpack.c.bf16 %v1496_v47, %v1495_v62 }
 0x17f   : > { %2380 = vmatmul.mubr.bf16.gmra.mrb[60].mxu1 %v1504_v36 }
 0x222   : > { %v2369_v44 = vpop.f32.mrb[48].mxu1 }
 0x223   : > { %v1619_v6 = vadd.f32 %v2369_v44, %v2059_v22  ;;  %v1610_v37 = vpop.f32.mrb[49].mxu1 }
 0x224   : > { %v1611_v39 = vadd.f32 %v2059_v22, %v1610_v37  ;;  %v2370_v40 = vpop.f32.mrb[50].mxu1 }
 0x225   : > { %v1622_v42 = vadd.f32 %v2370_v40, %v2059_v22  ;;  %v1613_v45 = vpop.f32.mrb[51].mxu1  ;;  %v1675_v46 = vmax.f32 %v1619_v6, 0.0 }
 0x226   : > { %v1614_v7 = vadd.f32 %v2059_v22, %v1613_v45  ;;  %v1673_v48 = vmax.f32 %v1611_v39, 0.0 }
 0x227   : > { %v1676_v61 = vmax.f32 %v1622_v42, 0.0 }
 0x228   : > { %v1674_v49 = vmax.f32 %v1614_v7, 0.0 }
 0x229   : > { %v1690_v50 = vpack.c.bf16 %v1676_v61, %v1675_v46 }
 0x22a   : > { %v1689_v52 = vpack.c.bf16 %v1674_v49, %v1673_v48 }
 0x22c   : > { %2399 = vmatprep.mubr.bf16.mxu0 %v1689_v52 }
 0x22d   : > { %2400 = vmatmul.mubr.bf16.vlgmr.msra.gmra.mrb[64].mxu0 %v1690_v50 }
 0x232   : > { %v2373_v51 = vpop.f32.mrb[52].mxu1 }
 0x233   : > { %v1635_v0 = vadd.f32 %v2373_v51, %v2059_v22  ;;  %v1626_v53 = vpop.f32.mrb[53].mxu1 }
 0x234   : > { %v1627_v15 = vadd.f32 %v2059_v22, %v1626_v53  ;;  %v2374_v54 = vpop.f32.mrb[54].mxu1 }
 0x235   : > { %v1638_v8 = vadd.f32 %v2374_v54, %v2059_v22  ;;  %v1629_v55 = vpop.f32.mrb[55].mxu1  ;;  %v1679_v59 = vmax.f32 %v1635_v0, 0.0 }
 0x236   : > { %v1630_v56 = vadd.f32 %v2059_v22, %v1629_v55  ;;  %v1677_v11 = vmax.f32 %v1627_v15, 0.0 }
 0x237   : > { %v1680_v25 = vmax.f32 %v1638_v8, 0.0 }
 0x238   : > { %v1678_v60 = vmax.f32 %v1630_v56, 0.0 }
 0x239   : > { %v1692_v18 = vpack.c.bf16 %v1680_v25, %v1679_v59 }
 0x23a   : > { %v1691_v63 = vpack.c.bf16 %v1678_v60, %v1677_v11 }
 0x23c   : > { %2403 = vmatprep.mubr.bf16.mxu0 %v1691_v63 }
 0x23d   : > { %2404 = vmatmul.mubr.bf16.gmra.mrb[68].mxu0 %v1692_v18 }
 0x242   : > { %v2377_v1 = vpop.f32.mrb[56].mxu1 }
 0x243   : > { %v1651_v21 = vadd.f32 %v2377_v1, %v2059_v22  ;;  %v1642_v33 = vpop.f32.mrb[57].mxu1 }
 0x244   : > { %v1643_v2 = vadd.f32 %v2059_v22, %v1642_v33  ;;  %v2378_v3 = vpop.f32.mrb[58].mxu1 }
 0x245   : > { %v1654_v4 = vadd.f32 %v2378_v3, %v2059_v22  ;;  %v1645_v5 = vpop.f32.mrb[59].mxu1  ;;  %v1683_v12 = vmax.f32 %v1651_v21, 0.0 }
 0x246   : > { %v1646_v9 = vadd.f32 %v2059_v22, %v1645_v5  ;;  %v1681_v13 = vmax.f32 %v1643_v2, 0.0 }
 0x247   : > { %v1684_v26 = vmax.f32 %v1654_v4, 0.0 }
 0x248   : > { %v1682_v14 = vmax.f32 %v1646_v9, 0.0 }
 0x249   : > { %v1694_v43 = vpack.c.bf16 %v1684_v26, %v1683_v12 }
 0x24a   : > { %v1693_v19 = vpack.c.bf16 %v1682_v14, %v1681_v13 }
 0x24c   : > { %2407 = vmatprep.mubr.bf16.mxu1 %v1693_v19 }
 0x24d   : > { %2408 = vmatmul.mubr.bf16.vlgmr.msra.gmra.mrb[64].mxu1 %v1694_v43 }
 0x252   : > { %v2381_v29 = vpop.f32.mrb[60].mxu1 }
 0x253   : > { %v1667_v38 = vadd.f32 %v2381_v29, %v2059_v22  ;;  %v1658_v10 = vpop.f32.mrb[61].mxu1 }
 0x254   : > { %v1659_v20 = vadd.f32 %v2059_v22, %v1658_v10  ;;  %v2382_v41 = vpop.f32.mrb[62].mxu1 }
 0x255   : > { %v1670_v23 = vadd.f32 %v2382_v41, %v2059_v22  ;;  %v1661_v16 = vpop.f32.mrb[63].mxu1  ;;  %v1687_v27 = vmax.f32 %v1667_v38, 0.0 }
 0x256   : > { %v1662_v24 = vadd.f32 %v2059_v22, %v1661_v16  ;;  %v1685_v30 = vmax.f32 %v1659_v20, 0.0 }
 0x257   : > { %v1688_v28 = vmax.f32 %v1670_v23, 0.0 }
 0x258   : > { %v1686_v31 = vmax.f32 %v1662_v24, 0.0 }
 0x259   : > { %v1696_v32 = vpack.c.bf16 %v1688_v28, %v1687_v27 }
 0x25a   : > { %v1695_v34 = vpack.c.bf16 %v1686_v31, %v1685_v30 }
 0x25c   : > { %2411 = vmatprep.mubr.bf16.mxu1 %v1695_v34 }
 0x25d   : > { %2412 = vmatmul.mubr.bf16.gmra.mrb[68].mxu1 %v1696_v32 }
 0x300   : > { %v2401_v35 = vpop.f32.mrb[64].mxu0 }
 0x301   : > { %v1811_v62 = vadd.f32 %v2401_v35, %v2068_v58  ;;  %v1802_v47 = vpop.f32.mrb[65].mxu0 }
 0x302   : > { %v1803_v36 = vadd.f32 %v2068_v58, %v1802_v47  ;;  %v2402_v57 = vpop.f32.mrb[66].mxu0 }
 0x303   : > { %1867 = vst [vmem:[%s3054_s16 + $0x10] sm:$0xff] %v1811_v62  ;;  %v1814_v17 = vadd.f32 %v2402_v57, %v2068_v58  ;;  %v1805_v22 = vpop.f32.mrb[67].mxu0 }
 0x304   : > { %1865 = vst [vmem:[%s3054_s16] sm:$0xff] %v1803_v36  ;;  %v1806_v44 = vadd.f32 %v2068_v58, %v1805_v22 }
 0x305   : > { %1868 = vst [vmem:[%s3054_s16 + $0x18] sm:$0xff] %v1814_v17 }
 0x306   : > { %1866 = vst [vmem:[%s3054_s16 + $0x8] sm:$0xff] %v1806_v44 }
 0x310   : > { %v2405_v6 = vpop.f32.mrb[68].mxu0 }
 0x311   : > { %v1827_v37 = vadd.f32 %v2405_v6, %v2068_v58  ;;  %v1818_v39 = vpop.f32.mrb[69].mxu0 }
 0x312   : > { %v1819_v40 = vadd.f32 %v2068_v58, %v1818_v39  ;;  %v2406_v42 = vpop.f32.mrb[70].mxu0 }
 0x313   : > { %1871 = vst [vmem:[%s3054_s16 + $0x30] sm:$0xff] %v1827_v37  ;;  %v1830_v45 = vadd.f32 %v2406_v42, %v2068_v58  ;;  %v1821_v7 = vpop.f32.mrb[71].mxu0 }
 0x314   : > { %1869 = vst [vmem:[%s3054_s16 + $0x20] sm:$0xff] %v1819_v40  ;;  %v1822_v46 = vadd.f32 %v2068_v58, %v1821_v7 }
 0x315   : > { %1872 = vst [vmem:[%s3054_s16 + $0x38] sm:$0xff] %v1830_v45 }
 0x316   : > { %1870 = vst [vmem:[%s3054_s16 + $0x28] sm:$0xff] %v1822_v46 }
 0x320   : > { %v2409_v61 = vpop.f32.mrb[64].mxu1 }
 0x321   : > { %v1843_v48 = vadd.f32 %v2409_v61, %v2068_v58  ;;  %v1834_v49 = vpop.f32.mrb[65].mxu1 }
 0x322   : > { %v1835_v50 = vadd.f32 %v2068_v58, %v1834_v49  ;;  %v2410_v52 = vpop.f32.mrb[66].mxu1 }
 0x323   : > { %1875 = vst [vmem:[%s3054_s16 + $0x50] sm:$0xff] %v1843_v48  ;;  %v1846_v51 = vadd.f32 %v2410_v52, %v2068_v58  ;;  %v1837_v0 = vpop.f32.mrb[67].mxu1 }
 0x324   : > { %1873 = vst [vmem:[%s3054_s16 + $0x40] sm:$0xff] %v1835_v50  ;;  %v1838_v53 = vadd.f32 %v2068_v58, %v1837_v0 }
 0x325   : > { %1876 = vst [vmem:[%s3054_s16 + $0x58] sm:$0xff] %v1846_v51 }
 0x326   : > { %1874 = vst [vmem:[%s3054_s16 + $0x48] sm:$0xff] %v1838_v53 }
 0x330   : > { %v2413_v15 = vpop.f32.mrb[68].mxu1 }
 0x331   : > { %v1859_v54 = vadd.f32 %v2413_v15, %v2068_v58  ;;  %v1850_v8 = vpop.f32.mrb[69].mxu1 }
 0x332   : > { %v1851_v55 = vadd.f32 %v2068_v58, %v1850_v8  ;;  %v2414_v56 = vpop.f32.mrb[70].mxu1 }
 0x333   : > { %1879 = vst [vmem:[%s3054_s16 + $0x70] sm:$0xff] %v1859_v54  ;;  %v1862_v59 = vadd.f32 %v2414_v56, %v2068_v58  ;;  %v1853_v25 = vpop.f32.mrb[71].mxu1 }
 0x334   : > { %1877 = vst [vmem:[%s3054_s16 + $0x60] sm:$0xff] %v1851_v55  ;;  %v1854_v11 = vadd.f32 %v2068_v58, %v1853_v25 }
 0x335   : > { %1880 = vst [vmem:[%s3054_s16 + $0x78] sm:$0xff] %v1862_v59 }
 0x336   : > { %1878 = vst [vmem:[%s3054_s16 + $0x68] sm:$0xff] %v1854_v11 }
 0x337 PF: > { %s17_s24 = sadd.s32 1, %s2598_s24  }
 0x338   : > { %p14_p4 = scmp.ge.s32.totalorder %s17_s24, 4  }
 0x33a   :  { %16 = sbr.rel (!%p14_p4) target bundleno = 1 (0x1), region = 78 }

</bundles_post_ra>
